<compile_context>
chip_gen: v6e
topology: v6e:2x2x1
jax: 0.10.0
libtpu: 0.0.40
codegen_flags: <defaults>
</compile_context>

<pallas_src>
import functools

import jax
import jax.numpy as jnp
from jax import lax
from jax.experimental import pallas as pl
from jax.experimental.pallas import tpu as pltpu


def _synthesis_kernel(coord_ref, vf_ref, in_ref, o_ref, *,
                      Hin, Win, Hin_pad, Win_pad, T):
    # coord_ref: (2, T)        base_x / base_y (unnormalized coords, no flow)
    # vf_ref:    (1, 3, T)     voxelflow [flow_x, flow_y, mask] for T pixels (lanes)
    # in_ref:    (1, 2, 3*Win_pad, Hin_pad)  bf16 frame pair, channels stacked on
    #            the row (sublane) axis, spatially transposed (x, y)
    # o_ref:     (1, 3, T)
    vf = vf_ref[0]                          # (3, T)
    fx = vf[0:1, :]                         # (1, T) raw voxelflow channel 0
    fy = vf[1:2, :]                         # (1, T) raw voxelflow channel 1
    m = 0.5 * (1.0 + vf[2:3, :])            # (1, T) blend mask

    base_x = coord_ref[0:1, :]              # (1, T) col * (Win-1)/(W-1)
    base_y = coord_ref[1:2, :]              # (1, T) row * (Hin-1)/(H-1)
    # grid_sample(align_corners=True) unnormalization of the 0.5*flow term.
    off_x = (0.25 * (Win - 1)) * fx
    off_y = (0.25 * (Hin - 1)) * fy

    # Tap-position iotas, shared by both frames.
    yi = lax.broadcasted_iota(jnp.int32, (Hin_pad, T), 0).astype(jnp.float32)
    xi = lax.broadcasted_iota(jnp.int32, (Win_pad, T), 0).astype(jnp.float32)

    def warp(f, ix, iy):
        # 'border' padding == clamp the source coordinate to the valid range.
        ix = jnp.clip(ix, 0.0, float(Win - 1))
        iy = jnp.clip(iy, 0.0, float(Win - 1) * 0.0 + float(Hin - 1))
        # Separable bilinear "tent" weights: (1-w) at floor(coord), w at
        # ceil(coord), 0 elsewhere (padded rows/cols always get weight 0).
        wy = jnp.maximum(1.0 - jnp.abs(yi - iy), 0.0).astype(jnp.bfloat16)  # (Hin_pad, T)
        wx = jnp.maximum(1.0 - jnp.abs(xi - ix), 0.0)                        # (Win_pad, T)

        # One fused bf16 MXU matmul per frame: (3*Win_pad, Hin_pad) @ (Hin_pad, T)
        img = in_ref[0, f]                                                   # bf16
        vcol = jnp.dot(img, wy, preferred_element_type=jnp.float32)         # (3*Win_pad, T)
        # Horizontal interpolation: per-channel elementwise mul + sublane reduce.
        return [jnp.sum(vcol[c * Win_pad:(c + 1) * Win_pad] * wx,
                        axis=0, keepdims=True) for c in range(3)]            # 3 x (1, T)

    o1 = warp(0, base_x - off_x, base_y - off_y)     # frame 1: grid - flow
    o2 = warp(1, base_x + off_x, base_y + off_y)     # frame 2: grid + flow

    # Accumulate-style blend, direct per-channel stores (lanes stay full-width).
    for c in range(3):
        o_ref[0, c:c + 1, :] = m * o1[c] + (1.0 - m) * o2[c]


def _round_up(x, m):
    return ((x + m - 1) // m) * m


def synthesis_forward(voxelflow, inp, *, max_tile=1024):
    """voxelflow: (B, 3, H, W) [flow_x, flow_y, mask];  inp: (B, 6, Hin, Win)."""
    B, c3, H, W = voxelflow.shape
    assert c3 == 3
    Bi, c6, Hin, Win = inp.shape
    assert c6 == 6 and Bi == B

    HW = H * W
    max_tile = max(128, (max_tile // 128) * 128)
    T = min(max_tile, _round_up(HW, 128))        # lane-dense tile, multiple of 128
    n_tiles = (HW + T - 1) // T
    HW_pad = n_tiles * T                         # padded pixel count (masked off later)

    Hin_pad = _round_up(Hin, 128)                # MXU contraction depth / frame lane dim
    Win_pad = _round_up(Win, 8)                  # sublane-aligned per-channel row count

    f32 = jnp.float32

    # Lane-dense voxelflow, zero-padded to HW_pad (padded pixels are discarded).
    vf_flat = voxelflow.reshape(B, 3, HW).astype(f32)
    if HW_pad != HW:
        vf_flat = jnp.pad(vf_flat, ((0, 0), (0, 0), (0, HW_pad - HW)))

    # Exact base (un-flowed) grid_sample coordinates, computed in the wrapper.
    sx = (Win - 1) / (W - 1) if W > 1 else 0.0
    sy = (Hin - 1) / (H - 1) if H > 1 else 0.0
    idx = jnp.arange(HW, dtype=jnp.int32)
    base = jnp.stack([(idx % W).astype(f32) * sx,
                      (idx // W).astype(f32) * sy], axis=0)       # (2, HW)
    if HW_pad != HW:
        base = jnp.pad(base, ((0, 0), (0, HW_pad - HW)))

    # Frame pair: transpose (x, y), zero-pad, stack channels on the row axis,
    # cast to bf16 (single-pass MXU operand, half the resident VMEM / HBM bytes).
    inp_t = jnp.transpose(inp.astype(f32), (0, 1, 3, 2))          # (B, 6, Win, Hin)
    inp_t = jnp.pad(inp_t, ((0, 0), (0, 0), (0, Win_pad - Win), (0, Hin_pad - Hin)))
    inp_fused = inp_t.reshape(B, 2, 3 * Win_pad, Hin_pad).astype(jnp.bfloat16)

    kernel = functools.partial(_synthesis_kernel, Hin=Hin, Win=Win,
                               Hin_pad=Hin_pad, Win_pad=Win_pad, T=T)

    flops = 2 * 2 * (3 * Win_pad) * Hin_pad * HW_pad * B          # both warps' matmuls
    bytes_accessed = (vf_flat.size * 4 + base.size * 4
                      + inp_fused.size * 2 + B * 3 * HW_pad * 4)

    out_flat = pl.pallas_call(
        kernel,
        out_shape=jax.ShapeDtypeStruct((B, 3, HW_pad), f32),
        grid_spec=pltpu.PrefetchScalarGridSpec(
            num_scalar_prefetch=0,
            grid=(B, n_tiles),
            in_specs=[
                pl.BlockSpec((2, T), lambda b, t: (0, t)),
                pl.BlockSpec((1, 3, T), lambda b, t: (b, 0, t)),
                # Whole frame pair per batch element; same block index across
                # the spatial tiles -> fetched once per b, VMEM-resident.
                pl.BlockSpec((1, 2, 3 * Win_pad, Hin_pad), lambda b, t: (b, 0, 0, 0)),
            ],
            out_specs=pl.BlockSpec((1, 3, T), lambda b, t: (b, 0, t)),
        ),
        compiler_params=pltpu.CompilerParams(
            dimension_semantics=("parallel", "parallel"),
            vmem_limit_bytes=32 * 1024 * 1024),
        cost_estimate=pl.CostEstimate(flops=flops, transcendentals=0,
                                      bytes_accessed=int(bytes_accessed)),
    )(base, vf_flat, inp_fused)

    return out_flat[:, :, :HW].reshape(B, 3, H, W)


def _reference(voxelflow, inp):
    """Pure-JAX reference (explicit f32 gather) for verification."""
    B, _, H, W = voxelflow.shape
    _, _, Hin, Win = inp.shape
    gx = jnp.broadcast_to(jnp.linspace(-1.0, 1.0, W, dtype=jnp.float32)[None, :], (H, W))
    gy = jnp.broadcast_to(jnp.linspace(-1.0, 1.0, H, dtype=jnp.float32)[:, None], (H, W))
    flow = 0.5 * voxelflow[:, 0:2]
    mask = 0.5 * (1.0 + voxelflow[:, 2:3])

    def sample(img, cx, cy):  # img: (3, Hin, Win); cx, cy: (H, W)
        ix = jnp.clip((cx + 1.0) * 0.5 * (Win - 1), 0.0, Win - 1.0)
        iy = jnp.clip((cy + 1.0) * 0.5 * (Hin - 1), 0.0, Hin - 1.0)
        x0 = jnp.floor(ix).astype(jnp.int32)
        y0 = jnp.floor(iy).astype(jnp.int32)
        wx = ix - x0
        wy = iy - y0
        x1 = jnp.minimum(x0 + 1, Win - 1)
        y1 = jnp.minimum(y0 + 1, Hin - 1)
        g = lambda yy, xx: img[:, yy, xx]
        return ((1 - wy) * (1 - wx) * g(y0, x0) + (1 - wy) * wx * g(y0, x1)
                + wy * (1 - wx) * g(y1, x0) + wy * wx * g(y1, x1))

    def one(b):
        o1 = sample(inp[b, 0:3], gx - flow[b, 0], gy - flow[b, 1])
        o2 = sample(inp[b, 3:6], gx + flow[b, 0], gy + flow[b, 1])
        return mask[b] * o1 + (1.0 - mask[b]) * o2

    return jnp.stack([one(b) for b in range(B)], axis=0)


if __name__ == "__main__":
    key = jax.random.PRNGKey(0)
    k1, k2, k3, k4 = jax.random.split(key, 4)

    # Case 1: square frames; single-tile and multi-tile (T=128, 2 tiles) paths.
    B, H, W = 2, 16, 16
    voxelflow = 0.5 * jax.random.normal(k1, (B, 3, H, W), dtype=jnp.float32)
    inp = jax.random.normal(k2, (B, 6, H, W), dtype=jnp.float32)
    ref = _reference(voxelflow, inp)

    out1 = jax.block_until_ready(synthesis_forward(voxelflow, inp))
    out2 = jax.block_until_ready(synthesis_forward(voxelflow, inp, max_tile=128))
    assert out1.shape == (B, 3, H, W)
    # bf16 MXU operands -> loosened tolerance vs the f32 reference.
    assert jnp.allclose(out1, ref, atol=5e-2, rtol=5e-2)
    assert jnp.allclose(out2, ref, atol=5e-2, rtol=5e-2)

    # Case 2: pixel count not a multiple of 128 and input resolution != flow grid
    # (exercises the HW padding and the Hin/Win padding paths).
    B2, H2, W2, Hin2, Win2 = 2, 8, 12, 12, 20
    voxelflow2 = 0.5 * jax.random.normal(k3, (B2, 3, H2, W2), dtype=jnp.float32)
    inp2 = jax.random.normal(k4, (B2, 6, Hin2, Win2), dtype=jnp.float32)
    ref2 = _reference(voxelflow2, inp2)
    out3 = jax.block_until_ready(synthesis_forward(voxelflow2, inp2))
    assert out3.shape == (B2, 3, H2, W2)
    assert jnp.allclose(out3, ref2, atol=5e-2, rtol=5e-2)

    print("KERNEL_OK")
</pallas_src>

<mosaic_0001>
module attributes {stable_mosaic.version = 11 : i64} {
  func.func @_synthesis_kernel(%arg0: i32, %arg1: i32, %arg2: memref<2x256xf32, #tpu.memory_space<vmem>>, %arg3: memref<1x3x256xf32, #tpu.memory_space<vmem>>, %arg4: memref<1x2x48x128xbf16, #tpu.memory_space<vmem>>, %arg5: memref<1x3x256xf32, #tpu.memory_space<vmem>>) attributes {dimension_semantics = [#tpu.dimension_semantics<parallel>, #tpu.dimension_semantics<parallel>], iteration_bounds = array<i64: 2, 1>, scalar_prefetch = 0 : i64, scratch_operands = 0 : i64, tpu.core_type = #tpu.core_type<tc>, window_params = [{transform_indices = @transform_0, window_bounds = array<i64: 2, 256>}, {transform_indices = @transform_1, window_bounds = array<i64: 1, 3, 256>}, {transform_indices = @transform_2, window_bounds = array<i64: 1, 2, 48, 128>}, {transform_indices = @transform_3, window_bounds = array<i64: 1, 3, 256>}]} {
    %c0 = arith.constant 0 : index
    %c0_0 = arith.constant 0 : index
    %c0_1 = arith.constant 0 : index
    %0 = vector.load %arg3[%c0, %c0_0, %c0_1] : memref<1x3x256xf32, #tpu.memory_space<vmem>>, vector<1x3x256xf32>
    %1 = vector.shape_cast %0 : vector<1x3x256xf32> to vector<3x256xf32>
    %2 = vector.extract_strided_slice %1 {offsets = [0, 0], sizes = [1, 256], strides = [1, 1]} : vector<3x256xf32> to vector<1x256xf32>
    %3 = vector.extract_strided_slice %1 {offsets = [1, 0], sizes = [1, 256], strides = [1, 1]} : vector<3x256xf32> to vector<1x256xf32>
    %4 = vector.extract_strided_slice %1 {offsets = [2, 0], sizes = [1, 256], strides = [1, 1]} : vector<3x256xf32> to vector<1x256xf32>
    %cst = arith.constant 1.000000e+00 : f32
    %5 = vector.broadcast %cst : f32 to vector<1x256xf32>
    %6 = arith.addf %5, %4 : vector<1x256xf32>
    %cst_2 = arith.constant 5.000000e-01 : f32
    %7 = vector.broadcast %cst_2 : f32 to vector<1x256xf32>
    %8 = arith.mulf %7, %6 : vector<1x256xf32>
    %c0_3 = arith.constant 0 : index
    %c0_4 = arith.constant 0 : index
    %9 = vector.load %arg2[%c0_3, %c0_4] : memref<2x256xf32, #tpu.memory_space<vmem>>, vector<1x256xf32>
    %c1 = arith.constant 1 : index
    %c0_5 = arith.constant 0 : index
    %10 = vector.load %arg2[%c1, %c0_5] : memref<2x256xf32, #tpu.memory_space<vmem>>, vector<1x256xf32>
    %cst_6 = arith.constant 3.750000e+00 : f32
    %11 = vector.broadcast %cst_6 : f32 to vector<1x256xf32>
    %12 = arith.mulf %11, %2 : vector<1x256xf32>
    %cst_7 = arith.constant 3.750000e+00 : f32
    %13 = vector.broadcast %cst_7 : f32 to vector<1x256xf32>
    %14 = arith.mulf %13, %3 : vector<1x256xf32>
    %15 = tpu.iota {dimensions = array<i32: 0>} : vector<128x256xi32>
    %16 = arith.sitofp %15 : vector<128x256xi32> to vector<128x256xf32>
    %17 = tpu.iota {dimensions = array<i32: 0>} : vector<16x256xi32>
    %18 = arith.sitofp %17 : vector<16x256xi32> to vector<16x256xf32>
    %19 = arith.subf %9, %12 : vector<1x256xf32>
    %20 = arith.subf %10, %14 : vector<1x256xf32>
    %cst_8 = arith.constant 0.000000e+00 : f32
    %cst_9 = arith.constant 1.500000e+01 : f32
    %21 = vector.broadcast %cst_8 : f32 to vector<1x256xf32>
    %22 = arith.maximumf %21, %19 : vector<1x256xf32>
    %23 = vector.broadcast %cst_9 : f32 to vector<1x256xf32>
    %24 = arith.minimumf %23, %22 : vector<1x256xf32>
    %cst_10 = arith.constant 0.000000e+00 : f32
    %cst_11 = arith.constant 1.500000e+01 : f32
    %25 = vector.broadcast %cst_10 : f32 to vector<1x256xf32>
    %26 = arith.maximumf %25, %20 : vector<1x256xf32>
    %27 = vector.broadcast %cst_11 : f32 to vector<1x256xf32>
    %28 = arith.minimumf %27, %26 : vector<1x256xf32>
    %29 = vector.broadcast %28 : vector<1x256xf32> to vector<128x256xf32>
    %30 = arith.subf %16, %29 : vector<128x256xf32>
    %31 = math.absf %30 : vector<128x256xf32>
    %cst_12 = arith.constant 1.000000e+00 : f32
    %32 = vector.broadcast %cst_12 : f32 to vector<128x256xf32>
    %33 = arith.subf %32, %31 : vector<128x256xf32>
    %cst_13 = arith.constant 0.000000e+00 : f32
    %34 = vector.broadcast %cst_13 : f32 to vector<128x256xf32>
    %35 = arith.maximumf %33, %34 : vector<128x256xf32>
    %36 = arith.truncf %35 : vector<128x256xf32> to vector<128x256xbf16>
    %37 = vector.broadcast %24 : vector<1x256xf32> to vector<16x256xf32>
    %38 = arith.subf %18, %37 : vector<16x256xf32>
    %39 = math.absf %38 : vector<16x256xf32>
    %cst_14 = arith.constant 1.000000e+00 : f32
    %40 = vector.broadcast %cst_14 : f32 to vector<16x256xf32>
    %41 = arith.subf %40, %39 : vector<16x256xf32>
    %cst_15 = arith.constant 0.000000e+00 : f32
    %42 = vector.broadcast %cst_15 : f32 to vector<16x256xf32>
    %43 = arith.maximumf %41, %42 : vector<16x256xf32>
    %c0_16 = arith.constant 0 : index
    %c0_17 = arith.constant 0 : index
    %c0_18 = arith.constant 0 : index
    %c0_19 = arith.constant 0 : index
    %44 = vector.load %arg4[%c0_16, %c0_17, %c0_18, %c0_19] : memref<1x2x48x128xbf16, #tpu.memory_space<vmem>>, vector<1x1x48x128xbf16>
    %45 = vector.shape_cast %44 : vector<1x1x48x128xbf16> to vector<48x128xbf16>
    %cst_20 = arith.constant dense<0.000000e+00> : vector<48x256xf32>
    %46 = tpu.matmul %45, %36, %cst_20 {dimension_numbers = #tpu.dot_dimension_numbers<[1], [0], [0], [1], [0, 0, 1, 1], [], []>} : vector<48x128xbf16>, vector<128x256xbf16>, vector<48x256xf32> -> vector<48x256xf32>
    %47 = vector.extract_strided_slice %46 {offsets = [0, 0], sizes = [16, 256], strides = [1, 1]} : vector<48x256xf32> to vector<16x256xf32>
    %48 = arith.mulf %47, %43 : vector<16x256xf32>
    %cst_21 = arith.constant dense<0.000000e+00> : vector<256xf32>
    %49 = vector.multi_reduction <add>, %48, %cst_21 [0] : vector<16x256xf32> to vector<256xf32>
    %50 = vector.shape_cast %49 : vector<256xf32> to vector<1x256xf32>
    %51 = vector.extract_strided_slice %46 {offsets = [16, 0], sizes = [16, 256], strides = [1, 1]} : vector<48x256xf32> to vector<16x256xf32>
    %52 = arith.mulf %51, %43 : vector<16x256xf32>
    %cst_22 = arith.constant dense<0.000000e+00> : vector<256xf32>
    %53 = vector.multi_reduction <add>, %52, %cst_22 [0] : vector<16x256xf32> to vector<256xf32>
    %54 = vector.shape_cast %53 : vector<256xf32> to vector<1x256xf32>
    %55 = vector.extract_strided_slice %46 {offsets = [32, 0], sizes = [16, 256], strides = [1, 1]} : vector<48x256xf32> to vector<16x256xf32>
    %56 = arith.mulf %55, %43 : vector<16x256xf32>
    %cst_23 = arith.constant dense<0.000000e+00> : vector<256xf32>
    %57 = vector.multi_reduction <add>, %56, %cst_23 [0] : vector<16x256xf32> to vector<256xf32>
    %58 = vector.shape_cast %57 : vector<256xf32> to vector<1x256xf32>
    %59 = arith.addf %9, %12 : vector<1x256xf32>
    %60 = arith.addf %10, %14 : vector<1x256xf32>
    %cst_24 = arith.constant 0.000000e+00 : f32
    %cst_25 = arith.constant 1.500000e+01 : f32
    %61 = vector.broadcast %cst_24 : f32 to vector<1x256xf32>
    %62 = arith.maximumf %61, %59 : vector<1x256xf32>
    %63 = vector.broadcast %cst_25 : f32 to vector<1x256xf32>
    %64 = arith.minimumf %63, %62 : vector<1x256xf32>
    %cst_26 = arith.constant 0.000000e+00 : f32
    %cst_27 = arith.constant 1.500000e+01 : f32
    %65 = vector.broadcast %cst_26 : f32 to vector<1x256xf32>
    %66 = arith.maximumf %65, %60 : vector<1x256xf32>
    %67 = vector.broadcast %cst_27 : f32 to vector<1x256xf32>
    %68 = arith.minimumf %67, %66 : vector<1x256xf32>
    %69 = vector.broadcast %68 : vector<1x256xf32> to vector<128x256xf32>
    %70 = arith.subf %16, %69 : vector<128x256xf32>
    %71 = math.absf %70 : vector<128x256xf32>
    %cst_28 = arith.constant 1.000000e+00 : f32
    %72 = vector.broadcast %cst_28 : f32 to vector<128x256xf32>
    %73 = arith.subf %72, %71 : vector<128x256xf32>
    %cst_29 = arith.constant 0.000000e+00 : f32
    %74 = vector.broadcast %cst_29 : f32 to vector<128x256xf32>
    %75 = arith.maximumf %73, %74 : vector<128x256xf32>
    %76 = arith.truncf %75 : vector<128x256xf32> to vector<128x256xbf16>
    %77 = vector.broadcast %64 : vector<1x256xf32> to vector<16x256xf32>
    %78 = arith.subf %18, %77 : vector<16x256xf32>
    %79 = math.absf %78 : vector<16x256xf32>
    %cst_30 = arith.constant 1.000000e+00 : f32
    %80 = vector.broadcast %cst_30 : f32 to vector<16x256xf32>
    %81 = arith.subf %80, %79 : vector<16x256xf32>
    %cst_31 = arith.constant 0.000000e+00 : f32
    %82 = vector.broadcast %cst_31 : f32 to vector<16x256xf32>
    %83 = arith.maximumf %81, %82 : vector<16x256xf32>
    %c0_32 = arith.constant 0 : index
    %c1_33 = arith.constant 1 : index
    %c0_34 = arith.constant 0 : index
    %c0_35 = arith.constant 0 : index
    %84 = vector.load %arg4[%c0_32, %c1_33, %c0_34, %c0_35] : memref<1x2x48x128xbf16, #tpu.memory_space<vmem>>, vector<1x1x48x128xbf16>
    %85 = vector.shape_cast %84 : vector<1x1x48x128xbf16> to vector<48x128xbf16>
    %cst_36 = arith.constant dense<0.000000e+00> : vector<48x256xf32>
    %86 = tpu.matmul %85, %76, %cst_36 {dimension_numbers = #tpu.dot_dimension_numbers<[1], [0], [0], [1], [0, 0, 1, 1], [], []>} : vector<48x128xbf16>, vector<128x256xbf16>, vector<48x256xf32> -> vector<48x256xf32>
    %87 = vector.extract_strided_slice %86 {offsets = [0, 0], sizes = [16, 256], strides = [1, 1]} : vector<48x256xf32> to vector<16x256xf32>
    %88 = arith.mulf %87, %83 : vector<16x256xf32>
    %cst_37 = arith.constant dense<0.000000e+00> : vector<256xf32>
    %89 = vector.multi_reduction <add>, %88, %cst_37 [0] : vector<16x256xf32> to vector<256xf32>
    %90 = vector.shape_cast %89 : vector<256xf32> to vector<1x256xf32>
    %91 = vector.extract_strided_slice %86 {offsets = [16, 0], sizes = [16, 256], strides = [1, 1]} : vector<48x256xf32> to vector<16x256xf32>
    %92 = arith.mulf %91, %83 : vector<16x256xf32>
    %cst_38 = arith.constant dense<0.000000e+00> : vector<256xf32>
    %93 = vector.multi_reduction <add>, %92, %cst_38 [0] : vector<16x256xf32> to vector<256xf32>
    %94 = vector.shape_cast %93 : vector<256xf32> to vector<1x256xf32>
    %95 = vector.extract_strided_slice %86 {offsets = [32, 0], sizes = [16, 256], strides = [1, 1]} : vector<48x256xf32> to vector<16x256xf32>
    %96 = arith.mulf %95, %83 : vector<16x256xf32>
    %cst_39 = arith.constant dense<0.000000e+00> : vector<256xf32>
    %97 = vector.multi_reduction <add>, %96, %cst_39 [0] : vector<16x256xf32> to vector<256xf32>
    %98 = vector.shape_cast %97 : vector<256xf32> to vector<1x256xf32>
    %99 = arith.mulf %8, %50 : vector<1x256xf32>
    %cst_40 = arith.constant 1.000000e+00 : f32
    %100 = vector.broadcast %cst_40 : f32 to vector<1x256xf32>
    %101 = arith.subf %100, %8 : vector<1x256xf32>
    %102 = arith.mulf %101, %90 : vector<1x256xf32>
    %103 = arith.addf %99, %102 : vector<1x256xf32>
    %c0_41 = arith.constant 0 : index
    %c0_42 = arith.constant 0 : index
    %c0_43 = arith.constant 0 : index
    %104 = vector.load %arg5[%c0_41, %c0_42, %c0_43] : memref<1x3x256xf32, #tpu.memory_space<vmem>>, vector<1x1x256xf32>
    %105 = vector.shape_cast %104 : vector<1x1x256xf32> to vector<1x256xf32>
    %106 = vector.shape_cast %103 : vector<1x256xf32> to vector<1x1x256xf32>
    tpu.vector_store %arg5[%c0_41, %c0_42, %c0_43], %106 {strides = array<i32>} : memref<1x3x256xf32, #tpu.memory_space<vmem>>, vector<1x1x256xf32>,
    %107 = arith.mulf %8, %54 : vector<1x256xf32>
    %cst_44 = arith.constant 1.000000e+00 : f32
    %108 = vector.broadcast %cst_44 : f32 to vector<1x256xf32>
    %109 = arith.subf %108, %8 : vector<1x256xf32>
    %110 = arith.mulf %109, %94 : vector<1x256xf32>
    %111 = arith.addf %107, %110 : vector<1x256xf32>
    %c0_45 = arith.constant 0 : index
    %c1_46 = arith.constant 1 : index
    %c0_47 = arith.constant 0 : index
    %112 = vector.load %arg5[%c0_45, %c1_46, %c0_47] : memref<1x3x256xf32, #tpu.memory_space<vmem>>, vector<1x1x256xf32>
    %113 = vector.shape_cast %112 : vector<1x1x256xf32> to vector<1x256xf32>
    %114 = vector.shape_cast %111 : vector<1x256xf32> to vector<1x1x256xf32>
    tpu.vector_store %arg5[%c0_45, %c1_46, %c0_47], %114 {strides = array<i32>} : memref<1x3x256xf32, #tpu.memory_space<vmem>>, vector<1x1x256xf32>,
    %115 = arith.mulf %8, %58 : vector<1x256xf32>
    %cst_48 = arith.constant 1.000000e+00 : f32
    %116 = vector.broadcast %cst_48 : f32 to vector<1x256xf32>
    %117 = arith.subf %116, %8 : vector<1x256xf32>
    %118 = arith.mulf %117, %98 : vector<1x256xf32>
    %119 = arith.addf %115, %118 : vector<1x256xf32>
    %c0_49 = arith.constant 0 : index
    %c2 = arith.constant 2 : index
    %c0_50 = arith.constant 0 : index
    %120 = vector.load %arg5[%c0_49, %c2, %c0_50] : memref<1x3x256xf32, #tpu.memory_space<vmem>>, vector<1x1x256xf32>
    %121 = vector.shape_cast %120 : vector<1x1x256xf32> to vector<1x256xf32>
    %122 = vector.shape_cast %119 : vector<1x256xf32> to vector<1x1x256xf32>
    tpu.vector_store %arg5[%c0_49, %c2, %c0_50], %122 {strides = array<i32>} : memref<1x3x256xf32, #tpu.memory_space<vmem>>, vector<1x1x256xf32>,
    return
  }
  func.func @transform_0(%arg0: i32, %arg1: i32) -> (i32, i32) {
    %c0_i32 = arith.constant 0 : i32
    %c0_i32_0 = arith.constant 0 : i32
    return %c0_i32, %arg1 : i32, i32
  }
  func.func @transform_1(%arg0: i32, %arg1: i32) -> (i32, i32, i32) {
    %c0_i32 = arith.constant 0 : i32
    %c0_i32_0 = arith.constant 0 : i32
    return %arg0, %c0_i32, %arg1 : i32, i32, i32
  }
  func.func @transform_2(%arg0: i32, %arg1: i32) -> (i32, i32, i32, i32) {
    %c0_i32 = arith.constant 0 : i32
    %c0_i32_0 = arith.constant 0 : i32
    %c0_i32_1 = arith.constant 0 : i32
    %c0_i32_2 = arith.constant 0 : i32
    return %arg0, %c0_i32, %c0_i32_0, %c0_i32_1 : i32, i32, i32, i32
  }
  func.func @transform_3(%arg0: i32, %arg1: i32) -> (i32, i32, i32) {
    %c0_i32 = arith.constant 0 : i32
    %c0_i32_0 = arith.constant 0 : i32
    return %arg0, %c0_i32, %arg1 : i32, i32, i32
  }
}

</mosaic_0001>

<bundles_post_ra>
// kernel: tpu_custom_call.1
= control target key start
LH: loop header
LB: loop body
LE: loop exit
PB: predicated region body
PF: predicated region fallthrough
CT: control target
= control target key end

     0   :  { %8 = vsyncpa [#allocation3], 0  ;;  %s1809_s0 = inlined_call_operand.vmem [shape: f32[2,256], index: 0, kind: input, shape index: {}]   ;;  %s1810_s1 = inlined_call_operand.vmem [shape: f32[2,3,256], index: 1, kind: input, shape index: {}]   ;;  %s1811_s2 = inlined_call_operand.hbm [shape: bf16[2,2,48,128], index: 2, kind: input, shape index: {}]   ;;  %s1812_s3 = inlined_call_operand.vmem [shape: f32[2,3,256], index: 3, kind: output, shape index: {}]  }
   0x1   :  { %10 = vsyncpa [#allocation3 + $0x1], 0  ;;  %s1425_s12 = smov 0   ;;  %s1427_s13 = smov 0  }
   0x2   :  { %s1429_s14 = smov 0   ;;  %s1431_s15 = smov 0  }
   0x3   :  { %s1433_s16 = smov 0   ;;  %s1435_s17 = smov 0  }
   0x4 LB: > { %s1222_s18 = sadd.s32 4294967295, %s1398_s17   ;;  %s28_s19 = sadd.s32 1, %s1394_s16  ;;  %s1398_s17 = sphi %s1435_s17, %s16_s17   ;;  %s1394_s16 = sphi %s1433_s16, %s1821_s16   ;;  %s1390_s15 = sphi %s1431_s15, %s1820_s15   ;;  %s1386_s14 = sphi %s1429_s14, %s1819_s14   ;;  %s1382_s13 = sphi %s1427_s13, %s1818_s13   ;;  %s1378_s12 = sphi %s1425_s12, %s1817_s12  }
   0x5   : > { %p30_p0 = scmp.ge.s32.totalorder %s28_s19, 2  ;;  %s89_s20 = sadd.s32 1, %s1386_s14 }
   0x6   : > { %p96_p1 = scmp.ne.s32.totalorder %s1386_s14, %s1382_s13  ;;  %p97_p2 = scmp.eq.s32.totalorder %s1398_s17, 0 }
   0x7   : > { %s1823_s19 = smov (%p30_p0, %s28_s19), 0  ;;  %p102_p4 = scmp.ne.s32.totalorder %s1382_s13, %s1378_s12 }
   0x8   : > { %p98_p3 = por %p97_p2, %p96_p1  ;;  %s86_s21 = ssub.s32 %s1394_s16, %s1823_s19 }
   0x9   : > { %p103_p5 = scmp.eq.s32.totalorder %s1222_s18, 0  ;;  %p87_p6 = scmp.eq.s32.totalorder %s86_s21, 0 }
   0xa   : > { %p1261_p8 = scmp.lt.s32.totalorder %s1398_s17, 2  ;;  %s176_s24 = sand.u32 1, %s1386_s14  }
   0xb   : > { %p1464_p7 = por %p103_p5, %p102_p4  ;;  %s1253_s25 = smul.u32 768, %s1394_s16 }
   0xc   : > { %s1470_s23 = scalar_select %p87_p6, %s1386_s14, %s89_s20  }
   0xd   : > { %s1252_s26 = smul.u32 48, %s176_s24  ;;  %s186_s29 = scalar_lea.hbm %s1811_s2, %s1253_s25 }
   0xe   : > { %p1477_p9 = pnand %p1261_p8, %p98_p3  ;;  %s177_s6 = scalar_lea.sflag [#allocation3], %s176_s24 }
   0xf   : > { %s180_s4 = scalar_lea.vmem [#allocation2], %s1252_s26  ;;  %s1400_s8 = smov [#allocation2]  }
  0x10   : > { %s187_s5 = sshll.u32 %s180_s4, 4  ;;  %p1322_p10 = pneg %p1477_p9  ;;  %s188_s5 = int_to_ptr.vmem [resolvable:$true] %s187_s5 }
  0x11   : > { %s1333_s7 = scalar_lea.vmem %s188_s5, 768  ;;  %s1338_s9 = sshll.u32 %s1400_s8, 4  ;;  %s1339_s9 = int_to_ptr.vmem [resolvable:$false] %s1338_s9 }
  0x12   : > { %p1334_p11 = scmp.ne.s32.totalorder %s188_s5, %s1333_s7  ;;  %s1340_s10 = scalar_lea.vmem %s1339_s9, 1536 }
  0x13   : > { %p1341_p0 = scmp.lt.s32.totalorder %s188_s5, %s1339_s9  ;;  %p1342_p1 = scmp.lt.s32.totalorder %s1340_s10, %s1333_s7 }
  0x14   : > { %p1336_p12 = pnand %p1334_p11, %p1322_p10 }
  0x15   : > { %p1343_p2 = por %p1342_p1, %p1341_p0 }
  0x16   : > { %p1337_p13 = pneg %p1336_p12 }
  0x18   : > { %p1344_p3 = pnand %p1343_p2, %p1337_p13 }
  0x1a   : > { %1347 = shalt.err (!%p1344_p3)
}
  0x1b   : > { %s1401_s11 = smov 64   ;;  %s1402_s12 = smov 4  }
  0x1c   : > { %1260 = dma.hbm_to_vmem [thread:$0]  (!%p1477_p9), %s186_s29, 768, %s188_s5, %s177_s6, %s1401_s11, %s1401_s11, %s1402_s12  }
  0x1d   : > { %p1228_p4 = scmp.ge.s32.totalorder %s1398_s17, 1  ;;  %p195_p5 = scmp.lt.s32.totalorder %s1398_s17, 3 }
  0x1f   : > { %p196_p6 = pnand %p1228_p4, %p195_p5 }
  0x20   : > { %s201_s18 = sand.u32 (!%p196_p6), 1, %s1382_s13  }
  0x21   : > { %199 = sbr.rel (%p196_p6) target bundleno = 392 (0x188), region = 32  ;;  %s202_s21 = scalar_lea.sflag (!%p196_p6), [#allocation3], %s201_s18 }
  0x22   : > { %s1254_s20 = smul.u32 (!%p196_p6), 48, %s201_s18 }
  0x24   : > { %s1488_s24 = scalar_lea.vmem (!%p196_p6), [#allocation2], %s1254_s20 }
  0x26   : > { %1373 = dma.done.wait (%p1464_p7), %s202_s21, 768  }
  0x27   : > { %1375 = vsyncadd (%p1464_p7), %s202_s21, 4294966528  ;;  %p253_p8 = scmp.lt.s32.totalorder %s1390_s15, 1  ;;  %v280_v0 = vlaneseq  ;;  %v1403_v1 = vmov 1966171168   ;;  %v1404_v3 = vmov 0  }
  0x28   : > { %v315_v2 = vunpack.c.l.s4 %v1403_v1  ;;  %582 = vmatprep.mubr.bf16.mxu0 %v1404_v3  ;;  %912 = vmatprep.mubr.bf16.mxu1 %v1404_v3  ;;  %v1233_v11 = vld [vmem:[%s1809_s0 + $0x1] ss:$2 sm:$0x3] }
  0x29   : > { %s1825_s15 = smov (!%p253_p8, %s1390_s15), 1  ;;  %v281_v4 = vshrl.u32 %v280_v0, 7  ;;  %vm1770_vm0 = vcmp.lt.s32.totalorder %v280_v0, 256 }
  0x2a   : > { %v316_v5 = vunpack.c.0.s8 %v315_v2  ;;  %s1250_s22 = sshll.u32 %s1825_s15, 3 }
  0x2b   : > { %s260_s27 = scalar_lea.vmem %s1810_s1, %s1250_s22  ;;  %v295_v9 = vadd.s32 112, %v281_v4  ;;  %v296_v12 = vadd.s32 120, %v281_v4  ;;  %v293_v13 = vadd.s32 96, %v281_v4  ;;  %v1520_v15 = vsub.s32 1, %v281_v4  ;;  %s1767_s7 = scalar_lea.vmem %s1812_s3, %s1250_s22 }
  0x2c   : > { %v1507_v6 = vsub.s32 %v316_v5, %v281_v4  ;;  %v1509_v7 = vld [vmem:[%s260_s27] sm:$0x77]  ;;  %v1523_v17 = vsub.s32 0, %v281_v4  ;;  %v294_v18 = vadd.s32 104, %v281_v4  ;;  %v291_v19 = vadd.s32 80, %v281_v4 }
  0x2d   : > { %v279_v8 = vmul.f32 3.75, %v1509_v7  ;;  %v311_v20 = vcvt.s32.f32 %v295_v9  ;;  %v312_v21 = vcvt.s32.f32 %v296_v12  ;;  %v292_v22 = vadd.s32 88, %v281_v4 }
  0x2e   : > { %v289_v23 = vadd.s32 64, %v281_v4  ;;  %v1525_v26 = vcvt.s32.f32 %v293_v13  ;;  %v290_v27 = vadd.s32 72, %v281_v4  ;;  %v287_v28 = vadd.s32 48, %v281_v4 }
  0x2f   : > { %v1513_v10 = vrot.slane %v279_v8, %v1507_v6  ;;  %v288_v29 = vadd.s32 56, %v281_v4  ;;  %v285_v30 = vadd.s32 32, %v281_v4  ;;  %v286_v31 = vadd.s32 40, %v281_v4 }
  0x30   : > { %v1527_v34 = vcvt.s32.f32 %v294_v18  ;;  %v1529_v35 = vcvt.s32.f32 %v291_v19  ;;  %v1531_v36 = vcvt.s32.f32 %v292_v22  ;;  %v283_v37 = vadd.s32 16, %v281_v4 }
  0x31   : > { %v330_v14 = vcombine.high %v1513_v10, %v1513_v10  ;;  %v284_v38 = vadd.s32 24, %v281_v4  ;;  %v282_v39 = vadd.s32 8, %v281_v4  ;;  %v1533_v42 = vcvt.s32.f32 %v289_v23 }
  0x32   : > { %v1535_v43 = vcvt.s32.f32 %v290_v27  ;;  %v1537_v44 = vcvt.s32.f32 %v287_v28  ;;  %v1539_v45 = vcvt.s32.f32 %v288_v29  ;;  %v1541_v46 = vcvt.s32.f32 %v285_v30 }
  0x33   : > { %v337_v16 = vrot.slane %v330_v14, %v1507_v6  ;;  %v1543_v47 = vcvt.s32.f32 %v286_v31  ;;  %v1557_v52 = vcvt.s32.f32 %v283_v37  ;;  %v1559_v53 = vcvt.s32.f32 %v284_v38 }
  0x34   : > { %v1561_v54 = vcvt.s32.f32 %v281_v4  ;;  %v1563_v55 = vcvt.s32.f32 %v282_v39 }
  0x35   : > { %v339_v24 = vsub.f32 %v1233_v11, %v337_v16  ;;  %v668_v25 = vadd.f32 %v1233_v11, %v337_v16 }
  0x37   : > { %v342_v32 = vmax.f32 %v339_v24, 0.0  ;;  %v671_v33 = vmax.f32 %v668_v25, 0.0 }
  0x39   : > { %v343_v40 = vmin.f32 %v342_v32, 15.0  ;;  %v672_v41 = vmin.f32 %v671_v33, 15.0 }
  0x3b   : > { %v1546_v48 = vrot.slane %v343_v40, %v1520_v15  ;;  %v1549_v49 = vrot.slane %v672_v41, %v1520_v15  ;;  %v1552_v50 = vrot.slane %v343_v40, %v1523_v17  ;;  %v1555_v51 = vrot.slane %v672_v41, %v1523_v17 }
  0x3d   : > { %v384_v56 = vsub.f32 %v311_v20, %v1546_v48  ;;  %v386_v57 = vsub.f32 %v312_v21, %v1546_v48  ;;  %v713_v58 = vsub.f32 %v311_v20, %v1549_v49  ;;  %v715_v59 = vsub.f32 %v312_v21, %v1549_v49 }
  0x3e   : > { %v383_v60 = vsub.f32 %v311_v20, %v1552_v50  ;;  %v385_v61 = vsub.f32 %v312_v21, %v1552_v50  ;;  %v712_v62 = vsub.f32 %v311_v20, %v1555_v51  ;;  %v714_v63 = vsub.f32 %v312_v21, %v1555_v51 }
  0x3f   : > { %v416_v1 = vand.u32 2147483647, %v384_v56  ;;  %v418_v2 = vand.u32 2147483647, %v386_v57  ;;  %v745_v4 = vand.u32 2147483647, %v713_v58  ;;  %v380_v5 = vsub.f32 %v1525_v26, %v1546_v48 }
  0x40   : > { %v747_v8 = vand.u32 2147483647, %v715_v59  ;;  %v415_v9 = vand.u32 2147483647, %v383_v60  ;;  %v417_v11 = vand.u32 2147483647, %v385_v61  ;;  %v382_v12 = vsub.f32 %v1527_v34, %v1546_v48 }
  0x41   : > { %v448_v13 = vsub.f32 1.0, %v416_v1  ;;  %v450_v14 = vsub.f32 1.0, %v418_v2  ;;  %v777_v16 = vsub.f32 1.0, %v745_v4  ;;  %v744_v18 = vand.u32 2147483647, %v712_v62 }
  0x42   : > { %v779_v19 = vsub.f32 1.0, %v747_v8  ;;  %v447_v20 = vsub.f32 1.0, %v415_v9  ;;  %v449_v22 = vsub.f32 1.0, %v417_v11  ;;  %v746_v21 = vand.u32 2147483647, %v714_v63 }
  0x43   : > { %v480_v23 = vmax.f32 %v448_v13, 0.0  ;;  %v482_v24 = vmax.f32 %v450_v14, 0.0  ;;  %v809_v25 = vmax.f32 %v777_v16, 0.0  ;;  %v776_v27 = vsub.f32 1.0, %v744_v18 }
  0x44   : > { %v811_v28 = vmax.f32 %v779_v19, 0.0  ;;  %v479_v29 = vmax.f32 %v447_v20, 0.0  ;;  %v481_v30 = vmax.f32 %v449_v22, 0.0  ;;  %v778_v31 = vsub.f32 1.0, %v746_v21 }
  0x45   : > { %v498_v32 = vpack.c.bf16 %v482_v24, %v480_v23  ;;  %v808_v33 = vmax.f32 %v776_v27, 0.0  ;;  %v412_v37 = vand.u32 2147483647, %v380_v5  ;;  %v414_v38 = vand.u32 2147483647, %v382_v12 }
  0x46   : > { %v827_v39 = vpack.c.bf16 %v811_v28, %v809_v25  ;;  %v497_v40 = vpack.c.bf16 %v481_v30, %v479_v29  ;;  %v810_v41 = vmax.f32 %v778_v31, 0.0  ;;  %v709_v56 = vsub.f32 %v1525_v26, %v1549_v49 }
  0x47   : > { %550 = vmatprep.subr.bf16.mxu0 %v498_v32  ;;  %v444_v57 = vsub.f32 1.0, %v412_v37  ;;  %v446_v58 = vsub.f32 1.0, %v414_v38  ;;  %v711_v59 = vsub.f32 %v1527_v34, %v1549_v49  ;;  %v379_v60 = vsub.f32 %v1525_v26, %v1552_v50 }
  0x48   : > { %880 = vmatprep.subr.bf16.mxu1 %v827_v39  ;;  %551 = vmatpush1.bf16.msra.mxu0 %v497_v40  ;;  %v826_v61 = vpack.c.bf16 %v810_v41, %v808_v33  ;;  %v741_v62 = vand.u32 2147483647, %v709_v56  ;;  %v381_v63 = vsub.f32 %v1527_v34, %v1552_v50  ;;  %v708_v1 = vsub.f32 %v1525_v26, %v1555_v51 }
  0x49   : > { %v476_v2 = vmax.f32 %v444_v57, 0.0  ;;  %v478_v4 = vmax.f32 %v446_v58, 0.0  ;;  %v743_v5 = vand.u32 2147483647, %v711_v59  ;;  %v411_v8 = vand.u32 2147483647, %v379_v60 }
  0x4a   : > { %881 = vmatpush1.bf16.msra.mxu1 %v826_v61  ;;  %v773_v9 = vsub.f32 1.0, %v741_v62  ;;  %v413_v11 = vand.u32 2147483647, %v381_v63  ;;  %v710_v12 = vsub.f32 %v1527_v34, %v1555_v51  ;;  %v740_v13 = vand.u32 2147483647, %v708_v1 }
  0x4b   : > { %v496_v14 = vpack.c.bf16 %v478_v4, %v476_v2  ;;  %v775_v16 = vsub.f32 1.0, %v743_v5  ;;  %v443_v18 = vsub.f32 1.0, %v411_v8  ;;  %v376_v19 = vsub.f32 %v1529_v35, %v1546_v48 }
  0x4c   : > { %v805_v20 = vmax.f32 %v773_v9, 0.0  ;;  %v445_v22 = vsub.f32 1.0, %v413_v11  ;;  %v742_v26 = vand.u32 2147483647, %v710_v12  ;;  %v772_v21 = vsub.f32 1.0, %v740_v13 }
  0x4d   : > { %552 = vmatprep.subr.bf16.mxu0 %v496_v14  ;;  %v807_v23 = vmax.f32 %v775_v16, 0.0  ;;  %v475_v24 = vmax.f32 %v443_v18, 0.0  ;;  %v378_v25 = vsub.f32 %v1531_v36, %v1546_v48  ;;  %v408_v27 = vand.u32 2147483647, %v376_v19 }
  0x4e   : > { %v477_v28 = vmax.f32 %v445_v22, 0.0  ;;  %v774_v34 = vsub.f32 1.0, %v742_v26  ;;  %v804_v29 = vmax.f32 %v772_v21, 0.0  ;;  %v705_v30 = vsub.f32 %v1529_v35, %v1549_v49 }
  0x4f   : > { %v825_v31 = vpack.c.bf16 %v807_v23, %v805_v20  ;;  %v410_v32 = vand.u32 2147483647, %v378_v25  ;;  %v440_v33 = vsub.f32 1.0, %v408_v27  ;;  %v707_v37 = vsub.f32 %v1531_v36, %v1549_v49 }
  0x50   : > { %v495_v38 = vpack.c.bf16 %v477_v28, %v475_v24  ;;  %v806_v39 = vmax.f32 %v774_v34, 0.0  ;;  %v737_v40 = vand.u32 2147483647, %v705_v30  ;;  %v375_v41 = vsub.f32 %v1529_v35, %v1552_v50 }
  0x51   : > { %882 = vmatprep.subr.bf16.mxu1 %v825_v31  ;;  %v442_v56 = vsub.f32 1.0, %v410_v32  ;;  %v472_v57 = vmax.f32 %v440_v33, 0.0  ;;  %v739_v58 = vand.u32 2147483647, %v707_v37  ;;  %v377_v59 = vsub.f32 %v1531_v36, %v1552_v50 }
  0x52   : > { %553 = vmatpush1.bf16.msra.mxu0 %v495_v38  ;;  %v824_v60 = vpack.c.bf16 %v806_v39, %v804_v29  ;;  %v769_v61 = vsub.f32 1.0, %v737_v40  ;;  %v407_v62 = vand.u32 2147483647, %v375_v41  ;;  %v704_v63 = vsub.f32 %v1529_v35, %v1555_v51 }
  0x53   : > { %v474_v1 = vmax.f32 %v442_v56, 0.0  ;;  %v771_v2 = vsub.f32 1.0, %v739_v58  ;;  %v409_v4 = vand.u32 2147483647, %v377_v59  ;;  %v706_v5 = vsub.f32 %v1531_v36, %v1555_v51 }
  0x54   : > { %883 = vmatpush1.bf16.msra.mxu1 %v824_v60  ;;  %v801_v8 = vmax.f32 %v769_v61, 0.0  ;;  %v439_v9 = vsub.f32 1.0, %v407_v62  ;;  %v736_v11 = vand.u32 2147483647, %v704_v63  ;;  %v372_v12 = vsub.f32 %v1533_v42, %v1546_v48 }
  0x55   : > { %v494_v13 = vpack.c.bf16 %v474_v1, %v472_v57  ;;  %v803_v14 = vmax.f32 %v771_v2, 0.0  ;;  %v441_v16 = vsub.f32 1.0, %v409_v4  ;;  %v738_v18 = vand.u32 2147483647, %v706_v5 }
  0x56   : > { %v471_v19 = vmax.f32 %v439_v9, 0.0  ;;  %v768_v20 = vsub.f32 1.0, %v736_v11  ;;  %v374_v35 = vsub.f32 %v1535_v43, %v1546_v48  ;;  %v404_v22 = vand.u32 2147483647, %v372_v12 }
  0x57   : > { %554 = vmatprep.subr.bf16.mxu0 %v494_v13  ;;  %v823_v26 = vpack.c.bf16 %v803_v14, %v801_v8  ;;  %v473_v36 = vmax.f32 %v441_v16, 0.0  ;;  %v770_v21 = vsub.f32 1.0, %v738_v18  ;;  %v701_v23 = vsub.f32 %v1533_v42, %v1549_v49 }
  0x58   : > { %v800_v24 = vmax.f32 %v768_v20, 0.0  ;;  %v406_v25 = vand.u32 2147483647, %v374_v35  ;;  %v436_v27 = vsub.f32 1.0, %v404_v22  ;;  %v703_v28 = vsub.f32 %v1535_v43, %v1549_v49 }
  0x59   : > { %884 = vmatprep.subr.bf16.mxu1 %v823_v26  ;;  %v493_v34 = vpack.c.bf16 %v473_v36, %v471_v19  ;;  %v802_v29 = vmax.f32 %v770_v21, 0.0  ;;  %v733_v30 = vand.u32 2147483647, %v701_v23  ;;  %v371_v31 = vsub.f32 %v1533_v42, %v1552_v50 }
  0x5a   : > { %v438_v32 = vsub.f32 1.0, %v406_v25  ;;  %v468_v33 = vmax.f32 %v436_v27, 0.0  ;;  %v735_v37 = vand.u32 2147483647, %v703_v28  ;;  %v373_v38 = vsub.f32 %v1535_v43, %v1552_v50 }
  0x5b   : > { %555 = vmatpush1.bf16.msra.mxu0 %v493_v34  ;;  %v822_v39 = vpack.c.bf16 %v802_v29, %v800_v24  ;;  %v765_v40 = vsub.f32 1.0, %v733_v30  ;;  %v403_v41 = vand.u32 2147483647, %v371_v31  ;;  %v700_v56 = vsub.f32 %v1533_v42, %v1555_v51 }
  0x5c   : > { %v470_v57 = vmax.f32 %v438_v32, 0.0  ;;  %v767_v58 = vsub.f32 1.0, %v735_v37  ;;  %v405_v59 = vand.u32 2147483647, %v373_v38  ;;  %v702_v60 = vsub.f32 %v1535_v43, %v1555_v51 }
  0x5d   : > { %885 = vmatpush1.bf16.msra.mxu1 %v822_v39  ;;  %v797_v61 = vmax.f32 %v765_v40, 0.0  ;;  %v435_v62 = vsub.f32 1.0, %v403_v41  ;;  %v732_v63 = vand.u32 2147483647, %v700_v56  ;;  %v368_v1 = vsub.f32 %v1537_v44, %v1546_v48 }
  0x5e   : > { %v492_v2 = vpack.c.bf16 %v470_v57, %v468_v33  ;;  %v799_v4 = vmax.f32 %v767_v58, 0.0  ;;  %v437_v5 = vsub.f32 1.0, %v405_v59  ;;  %v734_v8 = vand.u32 2147483647, %v702_v60 }
  0x5f   : > { %v467_v9 = vmax.f32 %v435_v62, 0.0  ;;  %v764_v11 = vsub.f32 1.0, %v732_v63  ;;  %v370_v42 = vsub.f32 %v1539_v45, %v1546_v48  ;;  %v400_v12 = vand.u32 2147483647, %v368_v1 }
  0x60   : > { %556 = vmatprep.subr.bf16.mxu0 %v492_v2  ;;  %v821_v13 = vpack.c.bf16 %v799_v4, %v797_v61  ;;  %v469_v43 = vmax.f32 %v437_v5, 0.0  ;;  %v766_v14 = vsub.f32 1.0, %v734_v8  ;;  %v697_v16 = vsub.f32 %v1537_v44, %v1549_v49 }
  0x61   : > { %v796_v18 = vmax.f32 %v764_v11, 0.0  ;;  %v402_v19 = vand.u32 2147483647, %v370_v42  ;;  %v432_v20 = vsub.f32 1.0, %v400_v12  ;;  %v699_v35 = vsub.f32 %v1539_v45, %v1549_v49 }
  0x62   : > { %886 = vmatprep.subr.bf16.mxu1 %v821_v13  ;;  %v491_v22 = vpack.c.bf16 %v469_v43, %v467_v9  ;;  %v798_v26 = vmax.f32 %v766_v14, 0.0  ;;  %v729_v36 = vand.u32 2147483647, %v697_v16  ;;  %v367_v21 = vsub.f32 %v1537_v44, %v1552_v50 }
  0x63   : > { %v434_v23 = vsub.f32 1.0, %v402_v19  ;;  %v464_v24 = vmax.f32 %v432_v20, 0.0  ;;  %v731_v25 = vand.u32 2147483647, %v699_v35  ;;  %v369_v27 = vsub.f32 %v1539_v45, %v1552_v50 }
  0x64   : > { %557 = vmatpush1.bf16.msra.mxu0 %v491_v22  ;;  %v820_v28 = vpack.c.bf16 %v798_v26, %v796_v18  ;;  %v761_v34 = vsub.f32 1.0, %v729_v36  ;;  %v399_v29 = vand.u32 2147483647, %v367_v21  ;;  %v696_v30 = vsub.f32 %v1537_v44, %v1555_v51 }
  0x65   : > { %v466_v31 = vmax.f32 %v434_v23, 0.0  ;;  %v763_v32 = vsub.f32 1.0, %v731_v25  ;;  %v401_v33 = vand.u32 2147483647, %v369_v27  ;;  %v698_v37 = vsub.f32 %v1539_v45, %v1555_v51 }
  0x66   : > { %887 = vmatpush1.bf16.msra.mxu1 %v820_v28  ;;  %v793_v38 = vmax.f32 %v761_v34, 0.0  ;;  %v431_v39 = vsub.f32 1.0, %v399_v29  ;;  %v728_v40 = vand.u32 2147483647, %v696_v30  ;;  %v364_v41 = vsub.f32 %v1541_v46, %v1546_v48 }
  0x67   : > { %v490_v56 = vpack.c.bf16 %v466_v31, %v464_v24  ;;  %v795_v57 = vmax.f32 %v763_v32, 0.0  ;;  %v433_v58 = vsub.f32 1.0, %v401_v33  ;;  %v730_v59 = vand.u32 2147483647, %v698_v37 }
  0x68   : > { %v463_v60 = vmax.f32 %v431_v39, 0.0  ;;  %v760_v61 = vsub.f32 1.0, %v728_v40  ;;  %v366_v44 = vsub.f32 %v1543_v47, %v1546_v48  ;;  %v396_v62 = vand.u32 2147483647, %v364_v41 }
  0x69   : > { %558 = vmatprep.subr.bf16.mxu0 %v490_v56  ;;  %v819_v63 = vpack.c.bf16 %v795_v57, %v793_v38  ;;  %v465_v45 = vmax.f32 %v433_v58, 0.0  ;;  %v762_v1 = vsub.f32 1.0, %v730_v59  ;;  %v693_v2 = vsub.f32 %v1541_v46, %v1549_v49 }
  0x6a   : > { %v792_v4 = vmax.f32 %v760_v61, 0.0  ;;  %v398_v5 = vand.u32 2147483647, %v366_v44  ;;  %v428_v8 = vsub.f32 1.0, %v396_v62  ;;  %v695_v9 = vsub.f32 %v1543_v47, %v1549_v49 }
  0x6b   : > { %888 = vmatprep.subr.bf16.mxu1 %v819_v63  ;;  %v489_v11 = vpack.c.bf16 %v465_v45, %v463_v60  ;;  %v794_v42 = vmax.f32 %v762_v1, 0.0  ;;  %v725_v12 = vand.u32 2147483647, %v693_v2  ;;  %v363_v13 = vsub.f32 %v1541_v46, %v1552_v50 }
  0x6c   : > { %v430_v43 = vsub.f32 1.0, %v398_v5  ;;  %v460_v14 = vmax.f32 %v428_v8, 0.0  ;;  %v727_v16 = vand.u32 2147483647, %v695_v9  ;;  %v365_v18 = vsub.f32 %v1543_v47, %v1552_v50 }
  0x6d   : > { %559 = vmatpush1.bf16.msra.mxu0 %v489_v11  ;;  %v818_v19 = vpack.c.bf16 %v794_v42, %v792_v4  ;;  %v757_v20 = vsub.f32 1.0, %v725_v12  ;;  %v395_v35 = vand.u32 2147483647, %v363_v13  ;;  %v692_v22 = vsub.f32 %v1541_v46, %v1555_v51 }
  0x6e   : > { %v462_v26 = vmax.f32 %v430_v43, 0.0  ;;  %v759_v36 = vsub.f32 1.0, %v727_v16  ;;  %v397_v21 = vand.u32 2147483647, %v365_v18  ;;  %v694_v23 = vsub.f32 %v1543_v47, %v1555_v51 }
  0x6f   : > { %889 = vmatpush1.bf16.msra.mxu1 %v818_v19  ;;  %v789_v24 = vmax.f32 %v757_v20, 0.0  ;;  %v427_v25 = vsub.f32 1.0, %v395_v35  ;;  %v724_v27 = vand.u32 2147483647, %v692_v22  ;;  %v360_v28 = vsub.f32 %v1557_v52, %v1546_v48 }
  0x70   : > { %v488_v34 = vpack.c.bf16 %v462_v26, %v460_v14  ;;  %v791_v29 = vmax.f32 %v759_v36, 0.0  ;;  %v429_v30 = vsub.f32 1.0, %v397_v21  ;;  %v726_v31 = vand.u32 2147483647, %v694_v23 }
  0x71   : > { %v459_v32 = vmax.f32 %v427_v25, 0.0  ;;  %v756_v33 = vsub.f32 1.0, %v724_v27  ;;  %v362_v46 = vsub.f32 %v1559_v53, %v1546_v48  ;;  %v392_v37 = vand.u32 2147483647, %v360_v28 }
  0x72   : > { %560 = vmatprep.subr.bf16.mxu0 %v488_v34  ;;  %v817_v38 = vpack.c.bf16 %v791_v29, %v789_v24  ;;  %v461_v47 = vmax.f32 %v429_v30, 0.0  ;;  %v758_v39 = vsub.f32 1.0, %v726_v31  ;;  %v689_v40 = vsub.f32 %v1557_v52, %v1549_v49 }
  0x73   : > { %v788_v41 = vmax.f32 %v756_v33, 0.0  ;;  %v394_v56 = vand.u32 2147483647, %v362_v46  ;;  %v424_v57 = vsub.f32 1.0, %v392_v37  ;;  %v691_v58 = vsub.f32 %v1559_v53, %v1549_v49 }
  0x74   : > { %890 = vmatprep.subr.bf16.mxu1 %v817_v38  ;;  %v487_v59 = vpack.c.bf16 %v461_v47, %v459_v32  ;;  %v790_v60 = vmax.f32 %v758_v39, 0.0  ;;  %v721_v61 = vand.u32 2147483647, %v689_v40  ;;  %v359_v44 = vsub.f32 %v1557_v52, %v1552_v50 }
  0x75   : > { %v426_v62 = vsub.f32 1.0, %v394_v56  ;;  %v456_v63 = vmax.f32 %v424_v57, 0.0  ;;  %v723_v45 = vand.u32 2147483647, %v691_v58  ;;  %v361_v1 = vsub.f32 %v1559_v53, %v1552_v50 }
  0x76   : > { %561 = vmatpush1.bf16.msra.mxu0 %v487_v59  ;;  %v816_v2 = vpack.c.bf16 %v790_v60, %v788_v41  ;;  %v753_v4 = vsub.f32 1.0, %v721_v61  ;;  %v391_v5 = vand.u32 2147483647, %v359_v44  ;;  %v688_v8 = vsub.f32 %v1557_v52, %v1555_v51 }
  0x77   : > { %v458_v9 = vmax.f32 %v426_v62, 0.0  ;;  %v755_v11 = vsub.f32 1.0, %v723_v45  ;;  %v393_v42 = vand.u32 2147483647, %v361_v1  ;;  %v690_v12 = vsub.f32 %v1559_v53, %v1555_v51 }
  0x78   : > { %891 = vmatpush1.bf16.msra.mxu1 %v816_v2  ;;  %v785_v13 = vmax.f32 %v753_v4, 0.0  ;;  %v423_v43 = vsub.f32 1.0, %v391_v5  ;;  %v720_v14 = vand.u32 2147483647, %v688_v8  ;;  %v356_v16 = vsub.f32 %v1561_v54, %v1546_v48 }
  0x79   : > { %v486_v18 = vpack.c.bf16 %v458_v9, %v456_v63  ;;  %v787_v19 = vmax.f32 %v755_v11, 0.0  ;;  %v425_v20 = vsub.f32 1.0, %v393_v42  ;;  %v722_v35 = vand.u32 2147483647, %v690_v12  ;;  %v1314_v9 = vld [vmem:[%s1488_s24] sm:$0xff]   ;;  %v1315_v42 = vld [vmem:[%s1488_s24 + $0x18] sm:$0xff]  }
  0x7a   : > { %v455_v22 = vmax.f32 %v423_v43, 0.0  ;;  %v752_v26 = vsub.f32 1.0, %v720_v14  ;;  %v358_v52 = vsub.f32 %v1563_v55, %v1546_v48  ;;  %v388_v36 = vand.u32 2147483647, %v356_v16  ;;  %v1316_v12 = vld [vmem:[%s1488_s24 + $0x8] sm:$0xff]   ;;  %v1318_v43 = vld [vmem:[%s1488_s24 + $0x10] sm:$0xff]  }
  0x7b   : > { %562 = vmatprep.subr.bf16.mxu0 %v486_v18  ;;  %v815_v21 = vpack.c.bf16 %v787_v19, %v785_v13  ;;  %v457_v53 = vmax.f32 %v425_v20, 0.0  ;;  %v754_v23 = vsub.f32 1.0, %v722_v35  ;;  %v685_v24 = vsub.f32 %v1561_v54, %v1549_v49  ;;  %v1317_v13 = vld [vmem:[%s1488_s24 + $0x20] sm:$0xff]   ;;  %v1319_v14 = vld [vmem:[%s1488_s24 + $0x28] sm:$0xff]  }
  0x7c   : > { %v784_v25 = vmax.f32 %v752_v26, 0.0  ;;  %v390_v27 = vand.u32 2147483647, %v358_v52  ;;  %v420_v28 = vsub.f32 1.0, %v388_v36  ;;  %v687_v34 = vsub.f32 %v1563_v55, %v1549_v49 }
  0x7d   : > { %892 = vmatprep.subr.bf16.mxu1 %v815_v21  ;;  %v485_v29 = vpack.c.bf16 %v457_v53, %v455_v22  ;;  %v786_v30 = vmax.f32 %v754_v23, 0.0  ;;  %v717_v31 = vand.u32 2147483647, %v685_v24  ;;  %v355_v48 = vsub.f32 %v1561_v54, %v1552_v50  ;;  %v276_v18 = vld [vmem:[%s1809_s0] ss:$2 sm:$0x3] }
  0x7e   : > { %v422_v32 = vsub.f32 1.0, %v390_v27  ;;  %v452_v33 = vmax.f32 %v420_v28, 0.0  ;;  %v719_v46 = vand.u32 2147483647, %v687_v34  ;;  %v357_v37 = vsub.f32 %v1563_v55, %v1552_v50 }
  0x7f   : > { %563 = vmatpush1.bf16.msra.mxu0 %v485_v29  ;;  %v814_v38 = vpack.c.bf16 %v786_v30, %v784_v25  ;;  %v749_v47 = vsub.f32 1.0, %v717_v31  ;;  %v387_v39 = vand.u32 2147483647, %v355_v48  ;;  %v684_v49 = vsub.f32 %v1561_v54, %v1555_v51 }
  0x80   : > { %v454_v40 = vmax.f32 %v422_v32, 0.0  ;;  %v751_v41 = vsub.f32 1.0, %v719_v46  ;;  %v389_v56 = vand.u32 2147483647, %v357_v37  ;;  %v686_v57 = vsub.f32 %v1563_v55, %v1555_v51 }
  0x81   : > { %893 = vmatpush1.bf16.msra.mxu1 %v814_v38  ;;  %v781_v58 = vmax.f32 %v749_v47, 0.0  ;;  %v419_v59 = vsub.f32 1.0, %v387_v39  ;;  %v716_v60 = vand.u32 2147483647, %v684_v49  ;;  %v327_v16 = vrot.slane %v1513_v10, %v1507_v6 }
  0x82   : > { %v484_v61 = vpack.c.bf16 %v454_v40, %v452_v33  ;;  %v783_v50 = vmax.f32 %v751_v41, 0.0  ;;  %v421_v44 = vsub.f32 1.0, %v389_v56  ;;  %v718_v62 = vand.u32 2147483647, %v686_v57 }
  0x83   : > { %v451_v63 = vmax.f32 %v419_v59, 0.0  ;;  %v748_v45 = vsub.f32 1.0, %v716_v60  ;;  %v329_v19 = vsub.f32 %v276_v18, %v327_v16  ;;  %v667_v20 = vadd.f32 %v327_v16, %v276_v18 }
  0x84   : > { %564 = vmatprep.subr.bf16.mxu0 %v484_v61  ;;  %v813_v1 = vpack.c.bf16 %v783_v50, %v781_v58  ;;  %v453_v2 = vmax.f32 %v421_v44, 0.0  ;;  %v750_v4 = vsub.f32 1.0, %v718_v62 }
  0x85   : > { %v780_v5 = vmax.f32 %v748_v45, 0.0  ;;  %v340_v35 = vmax.f32 %v329_v19, 0.0  ;;  %v669_v22 = vmax.f32 %v667_v20, 0.0 }
  0x86   : > { %894 = vmatprep.subr.bf16.mxu1 %v813_v1  ;;  %v483_v51 = vpack.c.bf16 %v453_v2, %v451_v63  ;;  %v782_v8 = vmax.f32 %v750_v4, 0.0 }
  0x87   : > { %v341_v26 = vmin.f32 %v340_v35, 15.0  ;;  %v670_v52 = vmin.f32 %v669_v22, 15.0 }
  0x88   : > { %565 = vmatpush1.bf16.msra.mxu0 %v483_v51  ;;  %v812_v11 = vpack.c.bf16 %v782_v8, %v780_v5 }
  0x89   : > { %v503_v36 = vrot.slane %v341_v26, %v1523_v17  ;;  %v507_v21 = vrot.slane %v341_v26, %v1520_v15  ;;  %v836_v53 = vrot.slane %v670_v52, %v1520_v15 }
  0x8a   : > { %895 = vmatpush1.bf16.msra.mxu1 %v812_v11 }
  0x8b   : > { %583 = vmatmul.mubr.bf16.vlgmr.msra.gmra.mxu0 %v1314_v9  ;;  %v510_v10 = vsub.f32 %v1561_v54, %v503_v36  ;;  %v512_v23 = vsub.f32 %v1563_v55, %v503_v36  ;;  %v511_v25 = vsub.f32 %v1561_v54, %v507_v21  ;;  %v513_v28 = vsub.f32 %v1563_v55, %v507_v21 }
  0x8c   : > { %592 = vmatprep.mubr.bf16.mxu0 %v1404_v3  ;;  %v840_v34 = vsub.f32 %v1561_v54, %v836_v53  ;;  %v842_v30 = vsub.f32 %v1563_v55, %v836_v53 }
  0x8d   : > { %913 = vmatmul.mubr.bf16.vlgmr.msra.gmra.mxu1 %v1315_v42  ;;  %v514_v29 = vand.u32 2147483647, %v510_v10  ;;  %v515_v15 = vand.u32 2147483647, %v511_v25  ;;  %v517_v32 = vand.u32 2147483647, %v513_v28 }
  0x8e   : > { %922 = vmatprep.mubr.bf16.mxu1 %v1404_v3  ;;  %v844_v33 = vand.u32 2147483647, %v840_v34  ;;  %v846_v38 = vand.u32 2147483647, %v842_v30 }
  0x8f   : > { %v518_v46 = vsub.f32 1.0, %v514_v29  ;;  %v519_v39 = vsub.f32 1.0, %v515_v15  ;;  %v521_v40 = vsub.f32 1.0, %v517_v32 }
  0x90   : > { %v848_v56 = vsub.f32 1.0, %v844_v33  ;;  %v850_v58 = vsub.f32 1.0, %v846_v38 }
  0x91   : > { %v1712_v57 = vmax.f32 %v518_v46, 0.0  ;;  %v1718_v61 = vmax.f32 %v519_v39, 0.0  ;;  %v1722_v44 = vmax.f32 %v521_v40, 0.0 }
  0x92   : > { %v1724_v62 = vmax.f32 %v848_v56, 0.0  ;;  %v1728_v4 = vmax.f32 %v850_v58, 0.0 }
  0x93   : > { %593 = vmatmul.mubr.bf16.gmra.mxu0 %v1316_v12 }
  0x94   : > { %602 = vmatprep.mubr.bf16.mxu0 %v1404_v3 }
  0x95   : > { %923 = vmatmul.mubr.bf16.gmra.mxu1 %v1317_v13 }
  0x96   : > { %932 = vmatprep.mubr.bf16.mxu1 %v1404_v3  ;;  %v832_v3 = vrot.slane %v670_v52, %v1523_v17  ;;  %v516_v17 = vand.u32 2147483647, %v512_v23 }
  0x98   : > { %v839_v24 = vsub.f32 %v1561_v54, %v832_v3  ;;  %v841_v27 = vsub.f32 %v1563_v55, %v832_v3  ;;  %v520_v37 = vsub.f32 1.0, %v516_v17 }
  0x9a   : > { %v843_v31 = vand.u32 2147483647, %v839_v24  ;;  %v845_v48 = vand.u32 2147483647, %v841_v27  ;;  %v1714_v54 = vmax.f32 %v520_v37, 0.0 }
  0x9b   : > { %603 = vmatmul.mubr.bf16.gmra.mxu0 %v1318_v43  ;;  %v274_v43 = vadd.f32 1.0, %v1509_v7 }
  0x9c   : > { %v847_v47 = vsub.f32 1.0, %v843_v31  ;;  %v849_v49 = vsub.f32 1.0, %v845_v48 }
  0x9d   : > { %933 = vmatmul.mubr.bf16.gmra.mxu1 %v1319_v14  ;;  %v1737_v53 = vmul.f32 0.5, %v274_v43 }
  0x9e   : > { %v1716_v55 = vmax.f32 %v847_v47, 0.0  ;;  %v1720_v50 = vmax.f32 %v849_v49, 0.0 }
 0x14b   : > { %v584_v41 = vpop.f32.mrf.mxu0 }
 0x14c   : > { %v613_v1 = vmul.f32 %v584_v41, %v1712_v57 }
 0x14d   : > { %v914_v59 = vpop.f32.mrf.mxu1  ;;  %v586_v60 = vpop.f32.mrf.mxu0 }
 0x14e   : > { %v943_v5 = vmul.f32 %v914_v59, %v1716_v55  ;;  %v614_v9 = vmul.f32 %v586_v60, %v1718_v61 }
 0x14f   : > { %v916_v63 = vpop.f32.mrf.mxu1  ;;  %v588_v45 = vpop.f32.mrf.mxu0 }
 0x150   : > { %v615_v2 = vmul.f32 %v588_v45, %v1714_v54  ;;  %v944_v13 = vmul.f32 %v916_v63, %v1724_v62 }
 0x151   : > { %v918_v51 = vpop.f32.mrf.mxu1  ;;  %v590_v8 = vpop.f32.mrf.mxu0 }
 0x152   : > { %v617_v11 = vadd.f32 %v615_v2, %v613_v1  ;;  %v945_v42 = vmul.f32 %v918_v51, %v1720_v50  ;;  %v616_v12 = vmul.f32 %v590_v8, %v1722_v44 }
 0x153   : > { %v920_v14 = vpop.f32.mrf.mxu1  ;;  %v594_v16 = vpop.f32.mrf.mxu0 }
 0x154   : > { %v618_v18 = vrot.slane %v617_v11, 4  ;;  %v947_v19 = vadd.f32 %v945_v42, %v943_v5  ;;  %v624_v20 = vadd.f32 %v616_v12, %v614_v9  ;;  %v946_v35 = vmul.f32 %v920_v14, %v1728_v4 }
 0x155   : > { %v924_v22 = vpop.f32.mrf.mxu1  ;;  %v596_v26 = vpop.f32.mrf.mxu0  ;;  %v631_v28 = vmul.f32 %v594_v16, %v1712_v57  ;;  %v1748_v9 = vsub.f32 1.0, %v1737_v53 }
 0x156   : > { %v619_v52 = vadd.f32 %v618_v18, %v617_v11  ;;  %v948_v36 = vrot.slane %v947_v19, 4  ;;  %v625_v3 = vrot.slane %v624_v20, 4  ;;  %v954_v21 = vadd.f32 %v946_v35, %v944_v13 }
 0x157   : > { %v926_v10 = vpop.f32.mrf.mxu1  ;;  %v598_v23 = vpop.f32.mrf.mxu0  ;;  %v961_v34 = vmul.f32 %v924_v22, %v1716_v55  ;;  %v632_v29 = vmul.f32 %v596_v26, %v1718_v61 }
 0x158   : > { %v620_v24 = vrot.slane %v619_v52, 2  ;;  %v949_v25 = vadd.f32 %v948_v36, %v947_v19  ;;  %v626_v7 = vadd.f32 %v625_v3, %v624_v20  ;;  %v955_v27 = vrot.slane %v954_v21, 4 }
 0x159   : > { %v633_v17 = vmul.f32 %v598_v23, %v1714_v54  ;;  %v928_v30 = vpop.f32.mrf.mxu1  ;;  %v600_v31 = vpop.f32.mrf.mxu0  ;;  %v962_v46 = vmul.f32 %v926_v10, %v1724_v62 }
 0x15a   : > { %v621_v15 = vadd.f32 %v620_v24, %v619_v52  ;;  %v950_v48 = vrot.slane %v949_v25, 2  ;;  %v627_v32 = vrot.slane %v626_v7, 2  ;;  %v956_v33 = vadd.f32 %v955_v27, %v954_v21 }
 0x15b   : > { %v635_v37 = vadd.f32 %v633_v17, %v631_v28  ;;  %v963_v38 = vmul.f32 %v928_v30, %v1720_v50  ;;  %v634_v47 = vmul.f32 %v600_v31, %v1722_v44  ;;  %v930_v39 = vpop.f32.mrf.mxu1  ;;  %v604_v49 = vpop.f32.mrf.mxu0 }
 0x15c   : > { %v622_v40 = vrot.slane %v621_v15, 1  ;;  %v951_v41 = vadd.f32 %v950_v48, %v949_v25  ;;  %v628_v56 = vadd.f32 %v627_v32, %v626_v7  ;;  %v957_v58 = vrot.slane %v956_v33, 2 }
 0x15d   : > { %v636_v59 = vrot.slane %v635_v37, 4  ;;  %v965_v60 = vadd.f32 %v963_v38, %v961_v34  ;;  %v642_v63 = vadd.f32 %v634_v47, %v632_v29  ;;  %v964_v45 = vmul.f32 %v930_v39, %v1728_v4  ;;  %v934_v1 = vpop.f32.mrf.mxu1  ;;  %v606_v2 = vpop.f32.mrf.mxu0 }
 0x15e   : > { %v952_v5 = vrot.slane %v951_v41, 1  ;;  %v629_v51 = vrot.slane %v628_v56, 1  ;;  %v958_v8 = vadd.f32 %v957_v58, %v956_v33  ;;  %v623_v14 = vadd.f32 %v622_v40, %v621_v15 }
 0x15f   : > { %v637_v11 = vadd.f32 %v636_v59, %v635_v37  ;;  %v966_v42 = vrot.slane %v965_v60, 4  ;;  %v643_v12 = vrot.slane %v642_v63, 4  ;;  %v972_v13 = vadd.f32 %v964_v45, %v962_v46  ;;  %v936_v43 = vpop.f32.mrf.mxu1  ;;  %v608_v52 = vpop.f32.mrf.mxu0 }
 0x160   : > { %v953_v16 = vadd.f32 %v952_v5, %v951_v41  ;;  %v630_v18 = vadd.f32 %v629_v51, %v628_v56  ;;  %v959_v19 = vrot.slane %v958_v8, 1  ;;  %v649_v21 = vmul.f32 %v604_v49, %v1712_v57 }
 0x161   : > { %v638_v20 = vrot.slane %v637_v11, 2  ;;  %v967_v35 = vadd.f32 %v966_v42, %v965_v60  ;;  %v644_v22 = vadd.f32 %v643_v12, %v642_v63  ;;  %v973_v26 = vrot.slane %v972_v13, 4  ;;  %v938_v23 = vpop.f32.mrf.mxu1  ;;  %v610_v32 = vpop.f32.mrf.mxu0 }
 0x162   : > { %v999_v36 = vcombine.low %v623_v14, %v630_v18  ;;  %v960_v3 = vadd.f32 %v959_v19, %v958_v8  ;;  %v979_v10 = vmul.f32 %v934_v1, %v1716_v55  ;;  %v650_v29 = vmul.f32 %v606_v2, %v1718_v61 }
 0x163   : > { %v639_v24 = vadd.f32 %v638_v20, %v637_v11  ;;  %v968_v25 = vrot.slane %v967_v35, 2  ;;  %v645_v7 = vrot.slane %v644_v22, 2  ;;  %v974_v27 = vadd.f32 %v973_v26, %v972_v13  ;;  %v940_v37 = vpop.f32.mrf.mxu1 }
 0x164   : > { %v1000_v28 = vrot.slane %v999_v36, 6  ;;  %v1006_v34 = vcombine.low %v953_v16, %v960_v3  ;;  %v651_v17 = vmul.f32 %v608_v52, %v1714_v54  ;;  %v981_v46 = vmul.f32 %v938_v23, %v1720_v50 }
 0x165   : > { %v640_v30 = vrot.slane %v639_v24, 1  ;;  %v969_v31 = vadd.f32 %v968_v25, %v967_v35  ;;  %v646_v15 = vadd.f32 %v645_v7, %v644_v22  ;;  %v975_v48 = vrot.slane %v974_v27, 2 }
 0x166   : > { %v1002_v57 = vmul.f32 %v1000_v28, %v1737_v53  ;;  %v1007_v33 = vrot.slane %v1006_v34, 6  ;;  %v653_v55 = vadd.f32 %v651_v17, %v649_v21  ;;  %v980_v49 = vmul.f32 %v936_v43, %v1724_v62 }
 0x167   : > { %v970_v38 = vrot.slane %v969_v31, 1  ;;  %v647_v47 = vrot.slane %v646_v15, 1  ;;  %v976_v39 = vadd.f32 %v975_v48, %v974_v27  ;;  %v983_v40 = vadd.f32 %v981_v46, %v979_v10 }
 0x168   : > { %v1009_v61 = vmul.f32 %v1007_v33, %v1748_v9  ;;  %v654_v54 = vrot.slane %v653_v55, 4  ;;  %v652_v41 = vmul.f32 %v610_v32, %v1722_v44  ;;  %v641_v56 = vadd.f32 %v640_v30, %v639_v24 }
 0x169   : > { %v648_v58 = vadd.f32 %v647_v47, %v646_v15  ;;  %v977_v59 = vrot.slane %v976_v39, 1  ;;  %v982_v60 = vmul.f32 %v940_v37, %v1728_v4  ;;  %v984_v50 = vrot.slane %v983_v40, 4 }
 0x16a   : > { %v1010_v63 = vadd.f32 %v1009_v61, %v1002_v57  ;;  %v655_v45 = vadd.f32 %v654_v54, %v653_v55  ;;  %v660_v1 = vadd.f32 %v652_v41, %v650_v29  ;;  %v971_v2 = vadd.f32 %v970_v38, %v969_v31 }
 0x16b   : > { %v1035_v5 = vcombine.low %v641_v56, %v648_v58  ;;  %v978_v51 = vadd.f32 %v977_v59, %v976_v39  ;;  %v990_v62 = vadd.f32 %v982_v60, %v980_v49  ;;  %v985_v42 = vadd.f32 %v984_v50, %v983_v40 }
 0x16c   : > { %v1018_v8 = vrot.slane %v1010_v63, %v1507_v6  ;;  %v656_v11 = vrot.slane %v655_v45, 2  ;;  %v661_v12 = vrot.slane %v660_v1, 4 }
 0x16d   : > { %v1036_v44 = vrot.slane %v1035_v5, 6  ;;  %v1041_v13 = vcombine.low %v971_v2, %v978_v51  ;;  %v991_v43 = vrot.slane %v990_v62, 4  ;;  %v986_v16 = vrot.slane %v985_v42, 2 }
 0x16e   : > { %v1025_v14 = vrot.slane %v1018_v8, %v1507_v6  ;;  %v657_v4 = vadd.f32 %v656_v11, %v655_v45  ;;  %v662_v18 = vadd.f32 %v661_v12, %v660_v1 }
 0x16f   : > { %v1038_v20 = vmul.f32 %v1036_v44, %v1737_v53  ;;  %v1042_v35 = vrot.slane %v1041_v13, 6  ;;  %v992_v22 = vadd.f32 %v991_v43, %v990_v62  ;;  %v987_v52 = vadd.f32 %v986_v16, %v985_v42 }
 0x170   : > { %v1026_v26 = vcombine.high %v1025_v14, %v1025_v14  ;;  %v663_v36 = vrot.slane %v662_v18, 2  ;;  %v658_v10 = vrot.slane %v657_v4, 1 }
 0x171   : > { %v1044_v3 = vmul.f32 %v1042_v35, %v1748_v9  ;;  %v993_v21 = vrot.slane %v992_v22, 2  ;;  %v988_v24 = vrot.slane %v987_v52, 1 }
 0x172   : > { %1032 = vst.msk [vmem:[%s1767_s7] ss:$4 sm:$0x3] %vm1770_vm0, %v1026_v26  ;;  %v664_v23 = vadd.f32 %v663_v36, %v662_v18  ;;  %v659_v34 = vadd.f32 %v658_v10, %v657_v4 }
 0x173   : > { %v1045_v0 = vadd.f32 %v1044_v3, %v1038_v20  ;;  %v994_v25 = vadd.f32 %v993_v21, %v992_v22  ;;  %v989_v30 = vadd.f32 %v988_v24, %v987_v52 }
 0x174   : > { %v665_v7 = vrot.slane %v664_v23, 1 }
 0x175   : > { %v1053_v27 = vrot.slane %v1045_v0, %v1507_v6  ;;  %v995_v28 = vrot.slane %v994_v25, 1 }
 0x176   : > { %v666_v29 = vadd.f32 %v665_v7, %v664_v23 }
 0x177   : > { %v1060_v17 = vrot.slane %v1053_v27, %v1507_v6  ;;  %v996_v31 = vadd.f32 %v995_v28, %v994_v25 }
 0x178   : > { %v1067_v15 = vcombine.low %v659_v34, %v666_v29 }
 0x179   : > { %v1061_v48 = vcombine.high %v1060_v17, %v1060_v17  ;;  %v1073_v32 = vcombine.low %v989_v30, %v996_v31 }
 0x17a   : > { %v1068_v57 = vrot.slane %v1067_v15, 6 }
 0x17b   : > { %1246 = vst.msk [vmem:[%s1767_s7 + $0x1] ss:$4 sm:$0x3] %vm1770_vm0, %v1061_v48  ;;  %v1074_v33 = vrot.slane %v1073_v32, 6 }
 0x17c   : > { %v1070_v55 = vmul.f32 %v1068_v57, %v1737_v53 }
 0x17d   : > { %v1076_v46 = vmul.f32 %v1074_v33, %v1748_v9 }
 0x17f   : > { %v1077_v37 = vadd.f32 %v1076_v46, %v1070_v55 }
 0x181   : > { %v1085_v38 = vrot.slane %v1077_v37, %v1507_v6 }
 0x183   : > { %v1092_v47 = vrot.slane %v1085_v38, %v1507_v6 }
 0x185   : > { %v1093_v39 = vcombine.high %v1092_v47, %v1092_v47 }
 0x187   : > { %1247 = vst.msk [vmem:[%s1767_s7 + $0x2] ss:$4 sm:$0x3] %vm1770_vm0, %v1093_v39 }
 0x188 PF: > { %s16_s17 = sadd.s32 1, %s1398_s17   ;;  %s1817_s12 = smov %s1382_s13 }
 0x189   : > { %p13_p7 = scmp.ge.s32.totalorder %s16_s17, 4   ;;  %s1818_s13 = smov %s1386_s14 }
 0x18a   : > { %s1819_s14 = smov %s1470_s23  ;;  %s1820_s15 = smov %s1394_s16 }
 0x18b   : > { %s1821_s16 = smov %s1823_s19  ;;  %15 = sbr.rel (!%p13_p7) target bundleno = 4 (0x4), region = 82 }
 0x190   :  { %1127 = vsyncpa [#allocation3], 1 }
 0x191   :  { %1129 = vsyncpa [#allocation3 + $0x1], 1 }

</bundles_post_ra>
